<compile_context>
chip_gen: v7x
topology: tpu7x:2x2x1
jax: 0.10.0
libtpu: 0.0.40
codegen_flags: <defaults>
</compile_context>

<pallas_src>
import functools

import jax
import jax.numpy as jnp
from jax.experimental import pallas as pl
from jax.experimental.pallas import tpu as pltpu

NEG_SLOPE = 0.01   # nn.LeakyReLU() default negative_slope
DROP_P = 0.2       # nn.Dropout(p=0.2)
LANE = 128
SUBLANE = 8


def _round_up(x, m):
    return ((x + m - 1) // m) * m


def _balanced_tile(n, align, max_tile):
    """Pick a tile size <= max_tile (multiple of `align`) that minimizes padding."""
    n_aligned = _round_up(max(n, 1), align)
    n_steps = pl.cdiv(n_aligned, max_tile)
    tile = _round_up(pl.cdiv(n_aligned, n_steps), align)
    return tile, n_steps * tile        # (tile, padded total)


# --------------------------------------------------------------------------- #
# Kernel
# --------------------------------------------------------------------------- #
def _gravlearn_kernel(adj_ref, emb_ref, w1_ref, b1_ref, w2_ref, b2_ref, *rest,
                      normalize: bool, apply_dropout: bool):
    if apply_dropout:
        mask_ref, out_ref, acc_ref = rest
    else:
        (out_ref, acc_ref), mask_ref = rest, None

    k = pl.program_id(1)                      # vocab (reduction) step

    @pl.when(k == 0)
    def _init():
        acc_ref[...] = jnp.zeros_like(acc_ref)

    # EmbeddingBag('sum', per_sample_weights) over row-normalized adjacency:
    # x = A @ base_emb, accumulated across vocab tiles (bf16 MXU, f32 accumulate).
    acc_ref[...] += jnp.dot(adj_ref[...], emb_ref[...],
                            preferred_element_type=jnp.float32)

    @pl.when(k == pl.num_programs(1) - 1)
    def _epilogue():
        x = acc_ref[...]

        # middle_layer: Linear(E, E)   (bias added once, in the epilogue only)
        h = jnp.dot(x.astype(jnp.bfloat16), w1_ref[...],
                    preferred_element_type=jnp.float32) + b1_ref[...]

        # dropout: mask already holds 0 or 1/(1-p); skipped entirely in eval mode
        if apply_dropout:
            h = h * mask_ref[...].astype(jnp.float32)

        # LeakyReLU (default slope 0.01)
        h = jnp.where(h >= 0.0, h, NEG_SLOPE * h)

        # output_layer: Linear(E, D)
        y = jnp.dot(h.astype(jnp.bfloat16), w2_ref[...],
                    preferred_element_type=jnp.float32) + b2_ref[...]

        if normalize:
            # F.normalize(y, p=2, dim=1): y / max(||y||, 1e-12) == y * rsqrt(max(ssq, 1e-24))
            ssq = jnp.sum(y * y, axis=1, keepdims=True)
            y = y * jax.lax.rsqrt(jnp.maximum(ssq, 1e-24))

        out_ref[...] = y


# --------------------------------------------------------------------------- #
# One-time parameter preparation (pad / transpose / cast, hoisted out of forward)
# --------------------------------------------------------------------------- #
def prepare_params(base_emb, w_mid, b_mid, w_out, b_out, *, max_tv=2048):
    V, E = base_emb.shape
    D = w_out.shape[0]
    E_pad = _round_up(E, LANE)
    D_pad = _round_up(D, LANE)

    # Balanced vocab (reduction) tile: avoids near-2x padding waste for awkward V.
    tv, V_pad = _balanced_tile(V, LANE, max_tv)

    def pad2(a, rows, cols):
        return jnp.pad(a, ((0, rows - a.shape[0]), (0, cols - a.shape[1])))

    emb = pad2(base_emb.astype(jnp.float32), V_pad, E_pad).astype(jnp.bfloat16)
    # PyTorch Linear stores [out, in]; pre-transpose to [in, out] once.
    w1 = pad2(w_mid.T.astype(jnp.float32), E_pad, E_pad).astype(jnp.bfloat16)
    b1 = jnp.pad(b_mid.astype(jnp.float32), (0, E_pad - E)).reshape(1, E_pad)
    w2 = pad2(w_out.T.astype(jnp.float32), E_pad, D_pad).astype(jnp.bfloat16)
    b2 = jnp.pad(b_out.astype(jnp.float32), (0, D_pad - D)).reshape(1, D_pad)

    return dict(emb=emb, w1=w1, b1=b1, w2=w2, b2=b2,
                V=V, V_pad=V_pad, tv=tv, E=E, E_pad=E_pad, D=D, D_pad=D_pad)


# --------------------------------------------------------------------------- #
# Forward
# --------------------------------------------------------------------------- #
def gravlearn_forward(adj, params, key=None, *, normalize=False, training=True,
                      max_tb=256):
    """adj: [B, V] dense row-normalized weighted adjacency.  Returns [B, D] f32."""
    B, V = adj.shape
    assert V == params["V"]
    V_pad, tv = params["V_pad"], params["tv"]
    E_pad, D_pad, D = params["E_pad"], params["D_pad"], params["D"]

    tb, B_pad = _balanced_tile(B, SUBLANE, max_tb)

    adj_p = jnp.pad(adj.astype(jnp.float32),
                    ((0, B_pad - B), (0, V_pad - V))).astype(jnp.bfloat16)

    apply_dropout = bool(training)
    operands = [adj_p, params["emb"], params["w1"], params["b1"],
                params["w2"], params["b2"]]
    in_specs = [
        pl.BlockSpec((tb, tv), lambda i, k: (i, k)),        # adjacency tile (streamed)
        pl.BlockSpec((tv, E_pad), lambda i, k: (k, 0)),     # base_emb tile (streamed)
        pl.BlockSpec((E_pad, E_pad), lambda i, k: (0, 0)),  # w_mid^T (resident)
        pl.BlockSpec((1, E_pad), lambda i, k: (0, 0)),      # b_mid
        pl.BlockSpec((E_pad, D_pad), lambda i, k: (0, 0)),  # w_out^T (resident)
        pl.BlockSpec((1, D_pad), lambda i, k: (0, 0)),      # b_out
    ]

    mask_bytes = 0
    if apply_dropout:
        assert key is not None, "training=True requires a PRNG key for dropout"
        keep = jax.random.bernoulli(key, 1.0 - DROP_P, (B_pad, E_pad))
        # 0.0 and 1/(1-0.2)=1.25 are exactly representable in bf16.
        mask = (keep.astype(jnp.float32) * (1.0 / (1.0 - DROP_P))).astype(jnp.bfloat16)
        operands.append(mask)
        in_specs.append(pl.BlockSpec((tb, E_pad), lambda i, k: (i, 0)))  # resident per i
        mask_bytes = mask.size * 2

    grid = (B_pad // tb, V_pad // tv)          # batch parallel, vocab reduction last

    flops = (2 * B_pad * V_pad * E_pad          # A @ emb
             + 2 * B_pad * E_pad * E_pad        # middle layer
             + 2 * B_pad * E_pad * D_pad)       # output layer
    bytes_accessed = (adj_p.size * 2 + params["emb"].size * 2
                      + params["w1"].size * 2 + params["w2"].size * 2
                      + (E_pad + D_pad) * 4
                      + mask_bytes + B_pad * D_pad * 4)
    cost = pl.CostEstimate(flops=flops,
                           transcendentals=B_pad if normalize else 0,
                           bytes_accessed=bytes_accessed)

    kernel = functools.partial(_gravlearn_kernel, normalize=normalize,
                               apply_dropout=apply_dropout)

    out_pad = pl.pallas_call(
        kernel,
        out_shape=jax.ShapeDtypeStruct((B_pad, D_pad), jnp.float32),
        grid_spec=pltpu.PrefetchScalarGridSpec(
            num_scalar_prefetch=0,
            grid=grid,
            in_specs=in_specs,
            out_specs=pl.BlockSpec((tb, D_pad), lambda i, k: (i, 0)),
            scratch_shapes=[pltpu.VMEM((tb, E_pad), jnp.float32)],  # x accumulator
        ),
        compiler_params=pltpu.CompilerParams(
            dimension_semantics=("parallel", "arbitrary"),
            vmem_limit_bytes=32 * 1024 * 1024,
        ),
        cost_estimate=cost,
    )(*operands)

    return out_pad[:B, :D]


def _row_normalize(adj_raw, weights):
    # Dense equivalent of _input_to_vec's sparse preprocessing:
    #   A.data *= weights[A.indices]; A = diag(1/max(1e-15, rowsum)) @ A
    a = adj_raw * weights[None, :]
    rowsum = jnp.sum(a, axis=1, keepdims=True)
    return a / jnp.maximum(1e-15, rowsum)


if __name__ == "__main__":
    # Small deterministic problem (consistent with the module's shapes):
    batch, vocab_size, base_emb_dim, dim = 8, 64, 32, 16

    key = jax.random.PRNGKey(0)
    k_emb, k_adj, k_w1, k_b1, k_w2, k_b2, k_drop = jax.random.split(key, 7)

    # base_emb passed to __init__ (frozen EmbeddingBag weight)
    base_emb = jax.random.normal(k_emb, (vocab_size, base_emb_dim), jnp.float32)

    # per-item weights: default path (weights=None -> ones)
    weights = jnp.ones((vocab_size,), jnp.float32)

    # "data" -> dense non-negative adjacency (stand-in for utils.to_adjacency_matrix)
    # TODO(synk): scipy-sparse CSR construction from raw graph data has no Pallas
    # equivalent; it is dense host-side glue here.
    adj_raw = jax.random.uniform(k_adj, (batch, vocab_size), jnp.float32)
    adj_raw = jnp.where(adj_raw > 0.7, adj_raw, 0.0)
    adj = _row_normalize(adj_raw, weights)

    # middle_layer: Linear(E, E)   (PyTorch layout [out, in])
    w_mid = 0.1 * jax.random.normal(k_w1, (base_emb_dim, base_emb_dim), jnp.float32)
    b_mid = 0.1 * jax.random.normal(k_b1, (base_emb_dim,), jnp.float32)
    # output_layer: Linear(E, dim)
    w_out = 0.1 * jax.random.normal(k_w2, (dim, base_emb_dim), jnp.float32)
    b_out = 0.1 * jax.random.normal(k_b2, (dim,), jnp.float32)

    # NOTE: self.scale is a parameter but is never used in forward() -> omitted.
    params = prepare_params(base_emb, w_mid, b_mid, w_out, b_out)

    # Training-mode call (dropout active).
    out = gravlearn_forward(adj, params, k_drop, normalize=False, training=True)
    out = jax.block_until_ready(out)
    assert out.shape == (batch, dim) and out.dtype == jnp.float32
    assert bool(jnp.all(jnp.isfinite(out)))

    # Eval-mode call with normalization (mask operand dropped, L2 rows).
    out_eval = gravlearn_forward(adj, params, normalize=True, training=False)
    out_eval = jax.block_until_ready(out_eval)
    assert out_eval.shape == (batch, dim)
    assert bool(jnp.all(jnp.isfinite(out_eval)))

    print("KERNEL_OK")
</pallas_src>

<mosaic_0001>
module attributes {stable_mosaic.version = 11 : i64} {
  func.func @_gravlearn_kernel(%arg0: i32, %arg1: i32, %arg2: memref<8x128xbf16, #tpu.memory_space<vmem>>, %arg3: memref<128x128xbf16, #tpu.memory_space<vmem>>, %arg4: memref<128x128xbf16, #tpu.memory_space<vmem>>, %arg5: memref<1x128xf32, #tpu.memory_space<vmem>>, %arg6: memref<128x128xbf16, #tpu.memory_space<vmem>>, %arg7: memref<1x128xf32, #tpu.memory_space<vmem>>, %arg8: memref<8x128xbf16, #tpu.memory_space<vmem>>, %arg9: memref<8x128xf32, #tpu.memory_space<vmem>>, %arg10: memref<8x128xf32, #tpu.memory_space<vmem>>) attributes {dimension_semantics = [#tpu.dimension_semantics<parallel>, #tpu.dimension_semantics<arbitrary>], iteration_bounds = array<i64: 1, 1>, scalar_prefetch = 0 : i64, scratch_operands = 1 : i64, tpu.core_type = #tpu.core_type<tc>, window_params = [{transform_indices = @transform_0, window_bounds = array<i64: 8, 128>}, {transform_indices = @transform_1, window_bounds = array<i64: 128, 128>}, {pipeline_mode = #tpu.pipeline_mode<synchronous>, transform_indices = @transform_2, window_bounds = array<i64: 128, 128>}, {pipeline_mode = #tpu.pipeline_mode<synchronous>, transform_indices = @transform_3, window_bounds = array<i64: 1, 128>}, {pipeline_mode = #tpu.pipeline_mode<synchronous>, transform_indices = @transform_4, window_bounds = array<i64: 128, 128>}, {pipeline_mode = #tpu.pipeline_mode<synchronous>, transform_indices = @transform_5, window_bounds = array<i64: 1, 128>}, {transform_indices = @transform_6, window_bounds = array<i64: 8, 128>}, {transform_indices = @transform_7, window_bounds = array<i64: 8, 128>}]} {
    %c0_i32 = arith.constant 0 : i32
    %0 = arith.cmpi eq, %arg1, %c0_i32 : i32
    %1 = arith.extui %0 : i1 to i32
    %c0_i32_0 = arith.constant 0 : i32
    %2 = arith.cmpi ne, %1, %c0_i32_0 : i32
    scf.if %2 {
      %cst_10 = arith.constant 0.000000e+00 : f32
      %12 = vector.broadcast %cst_10 : f32 to vector<8x128xf32>
      %c0_11 = arith.constant 0 : index
      %c0_12 = arith.constant 0 : index
      %13 = vector.load %arg10[%c0_11, %c0_12] : memref<8x128xf32, #tpu.memory_space<vmem>>, vector<8x128xf32>
      tpu.vector_store %arg10[%c0_11, %c0_12], %12 {strides = array<i32>} : memref<8x128xf32, #tpu.memory_space<vmem>>, vector<8x128xf32>,
    } else {
    }
    %c0 = arith.constant 0 : index
    %c0_1 = arith.constant 0 : index
    %3 = vector.load %arg10[%c0, %c0_1] : memref<8x128xf32, #tpu.memory_space<vmem>>, vector<8x128xf32>
    %c0_2 = arith.constant 0 : index
    %c0_3 = arith.constant 0 : index
    %4 = vector.load %arg2[%c0_2, %c0_3] : memref<8x128xbf16, #tpu.memory_space<vmem>>, vector<8x128xbf16>
    %c0_4 = arith.constant 0 : index
    %c0_5 = arith.constant 0 : index
    %5 = vector.load %arg3[%c0_4, %c0_5] : memref<128x128xbf16, #tpu.memory_space<vmem>>, vector<128x128xbf16>
    %cst = arith.constant dense<0.000000e+00> : vector<8x128xf32>
    %6 = tpu.matmul %4, %5, %cst {dimension_numbers = #tpu.dot_dimension_numbers<[1], [0], [0], [1], [0, 0, 1, 1], [], []>} : vector<8x128xbf16>, vector<128x128xbf16>, vector<8x128xf32> -> vector<8x128xf32>
    %7 = arith.addf %3, %6 : vector<8x128xf32>
    %c0_6 = arith.constant 0 : index
    %c0_7 = arith.constant 0 : index
    %8 = vector.load %arg10[%c0_6, %c0_7] : memref<8x128xf32, #tpu.memory_space<vmem>>, vector<8x128xf32>
    tpu.vector_store %arg10[%c0_6, %c0_7], %7 {strides = array<i32>} : memref<8x128xf32, #tpu.memory_space<vmem>>, vector<8x128xf32>,
    %c0_i32_8 = arith.constant 0 : i32
    %9 = arith.cmpi eq, %arg1, %c0_i32_8 : i32
    %10 = arith.extui %9 : i1 to i32
    %c0_i32_9 = arith.constant 0 : i32
    %11 = arith.cmpi ne, %10, %c0_i32_9 : i32
    scf.if %11 {
      %c0_10 = arith.constant 0 : index
      %c0_11 = arith.constant 0 : index
      %12 = vector.load %arg10[%c0_10, %c0_11] : memref<8x128xf32, #tpu.memory_space<vmem>>, vector<8x128xf32>
      %13 = arith.truncf %12 : vector<8x128xf32> to vector<8x128xbf16>
      %c0_12 = arith.constant 0 : index
      %c0_13 = arith.constant 0 : index
      %14 = vector.load %arg4[%c0_12, %c0_13] : memref<128x128xbf16, #tpu.memory_space<vmem>>, vector<128x128xbf16>
      %cst_14 = arith.constant dense<0.000000e+00> : vector<8x128xf32>
      %15 = tpu.matmul %13, %14, %cst_14 {dimension_numbers = #tpu.dot_dimension_numbers<[1], [0], [0], [1], [0, 0, 1, 1], [], []>} : vector<8x128xbf16>, vector<128x128xbf16>, vector<8x128xf32> -> vector<8x128xf32>
      %c0_15 = arith.constant 0 : index
      %c0_16 = arith.constant 0 : index
      %16 = vector.load %arg5[%c0_15, %c0_16] : memref<1x128xf32, #tpu.memory_space<vmem>>, vector<1x128xf32>
      %17 = vector.broadcast %16 : vector<1x128xf32> to vector<8x128xf32>
      %18 = arith.addf %15, %17 : vector<8x128xf32>
      %c0_17 = arith.constant 0 : index
      %c0_18 = arith.constant 0 : index
      %19 = vector.load %arg8[%c0_17, %c0_18] : memref<8x128xbf16, #tpu.memory_space<vmem>>, vector<8x128xbf16>
      %20 = arith.extf %19 : vector<8x128xbf16> to vector<8x128xf32>
      %21 = arith.mulf %18, %20 : vector<8x128xf32>
      %cst_19 = arith.constant 0.000000e+00 : f32
      %22 = vector.broadcast %cst_19 : f32 to vector<8x128xf32>
      %23 = arith.cmpf oge, %21, %22 : vector<8x128xf32>
      %cst_20 = arith.constant 0.00999999977 : f32
      %24 = vector.broadcast %cst_20 : f32 to vector<8x128xf32>
      %25 = arith.mulf %24, %21 : vector<8x128xf32>
      %26 = arith.select %23, %21, %25 : vector<8x128xi1>, vector<8x128xf32>
      %27 = arith.truncf %26 : vector<8x128xf32> to vector<8x128xbf16>
      %c0_21 = arith.constant 0 : index
      %c0_22 = arith.constant 0 : index
      %28 = vector.load %arg6[%c0_21, %c0_22] : memref<128x128xbf16, #tpu.memory_space<vmem>>, vector<128x128xbf16>
      %cst_23 = arith.constant dense<0.000000e+00> : vector<8x128xf32>
      %29 = tpu.matmul %27, %28, %cst_23 {dimension_numbers = #tpu.dot_dimension_numbers<[1], [0], [0], [1], [0, 0, 1, 1], [], []>} : vector<8x128xbf16>, vector<128x128xbf16>, vector<8x128xf32> -> vector<8x128xf32>
      %c0_24 = arith.constant 0 : index
      %c0_25 = arith.constant 0 : index
      %30 = vector.load %arg7[%c0_24, %c0_25] : memref<1x128xf32, #tpu.memory_space<vmem>>, vector<1x128xf32>
      %31 = vector.broadcast %30 : vector<1x128xf32> to vector<8x128xf32>
      %32 = arith.addf %29, %31 : vector<8x128xf32>
      %c0_26 = arith.constant 0 : index
      %c0_27 = arith.constant 0 : index
      %33 = vector.load %arg9[%c0_26, %c0_27] : memref<8x128xf32, #tpu.memory_space<vmem>>, vector<8x128xf32>
      tpu.vector_store %arg9[%c0_26, %c0_27], %32 {strides = array<i32>} : memref<8x128xf32, #tpu.memory_space<vmem>>, vector<8x128xf32>,
    } else {
    }
    return
  }
  func.func @transform_0(%arg0: i32, %arg1: i32) -> (i32, i32) {
    %c0_i32 = arith.constant 0 : i32
    return %arg0, %arg1 : i32, i32
  }
  func.func @transform_1(%arg0: i32, %arg1: i32) -> (i32, i32) {
    %c0_i32 = arith.constant 0 : i32
    %c0_i32_0 = arith.constant 0 : i32
    return %arg1, %c0_i32 : i32, i32
  }
  func.func @transform_2(%arg0: i32, %arg1: i32) -> (i32, i32) {
    %c0_i32 = arith.constant 0 : i32
    %c0_i32_0 = arith.constant 0 : i32
    %c0_i32_1 = arith.constant 0 : i32
    return %c0_i32, %c0_i32_0 : i32, i32
  }
  func.func @transform_3(%arg0: i32, %arg1: i32) -> (i32, i32) {
    %c0_i32 = arith.constant 0 : i32
    %c0_i32_0 = arith.constant 0 : i32
    %c0_i32_1 = arith.constant 0 : i32
    return %c0_i32, %c0_i32_0 : i32, i32
  }
  func.func @transform_4(%arg0: i32, %arg1: i32) -> (i32, i32) {
    %c0_i32 = arith.constant 0 : i32
    %c0_i32_0 = arith.constant 0 : i32
    %c0_i32_1 = arith.constant 0 : i32
    return %c0_i32, %c0_i32_0 : i32, i32
  }
  func.func @transform_5(%arg0: i32, %arg1: i32) -> (i32, i32) {
    %c0_i32 = arith.constant 0 : i32
    %c0_i32_0 = arith.constant 0 : i32
    %c0_i32_1 = arith.constant 0 : i32
    return %c0_i32, %c0_i32_0 : i32, i32
  }
  func.func @transform_6(%arg0: i32, %arg1: i32) -> (i32, i32) {
    %c0_i32 = arith.constant 0 : i32
    %c0_i32_0 = arith.constant 0 : i32
    return %arg0, %c0_i32 : i32, i32
  }
  func.func @transform_7(%arg0: i32, %arg1: i32) -> (i32, i32) {
    %c0_i32 = arith.constant 0 : i32
    %c0_i32_0 = arith.constant 0 : i32
    return %arg0, %c0_i32 : i32, i32
  }
}

</mosaic_0001>

<bundles_post_ra>
// kernel: tpu_custom_call.1
= control target key start
LH: loop header
LB: loop body
LE: loop exit
PB: predicated region body
PF: predicated region fallthrough
CT: control target
= control target key end

     0   :  { %12 = vsyncpa [#allocation4], 0  ;;  %s867_s0 = inlined_call_operand.hbm [shape: bf16[8,128], index: 0, kind: input, shape index: {}]   ;;  %s868_s1 = inlined_call_operand.hbm [shape: bf16[128,128], index: 1, kind: input, shape index: {}]   ;;  %s869_s2 = inlined_call_operand.hbm [shape: bf16[128,128], index: 2, kind: input, shape index: {}]   ;;  %s870_s3 = inlined_call_operand.vmem [shape: f32[1,128], index: 3, kind: input, shape index: {}]   ;;  %s871_s4 = inlined_call_operand.hbm [shape: bf16[128,128], index: 4, kind: input, shape index: {}]   ;;  %s872_s5 = inlined_call_operand.vmem [shape: f32[1,128], index: 5, kind: input, shape index: {}]   ;;  %s873_s6 = inlined_call_operand.vmem [shape: bf16[8,128], index: 6, kind: input, shape index: {}]   ;;  %s874_s7 = inlined_call_operand.hbm [shape: f32[8,128], index: 7, kind: output, shape index: {}]  }
   0x1   :  { %13 = vsyncpa [#allocation7], 0 }
   0x2   :  { %14 = vsyncpa [#allocation10], 0 }
   0x3   :  { %15 = vsyncpa [#allocation5], 0  ;;  %s710_s24 = smov [#allocation6]   ;;  %s592_s28 = scalar_lea.hbm %s868_s1, 1024 }
   0x4   :  { %s31_s25 = sshll.u32 %s710_s24, 4  ;;  %p593_p0 = scmp.ne.s32.totalorder %s868_s1, %s592_s28  ;;  %s32_s25 = int_to_ptr.vmem [resolvable:$true] %s31_s25 }
   0x5   :  { %p596_p1 = scmp.lt.u32.totalorder %s592_s28, %s868_s1 }
   0x7   :  { %p598_p2 = pnand %p596_p1, %p593_p0 }
   0x9   :  { %601 = shalt.err (!%p598_p2)
}
   0xa   :  { %s602_s10 = scalar_lea.vmem %s32_s25, 1024  ;;  %p607_p4 = scmp.lt.s32.totalorder %s32_s25, %s32_s25 }
   0xb   :  { %p603_p3 = scmp.ne.s32.totalorder %s32_s25, %s602_s10  ;;  %p608_p5 = scmp.lt.s32.totalorder %s602_s10, %s602_s10 }
   0xd   :  { %p609_p6 = por %p608_p5, %p607_p4 }
   0xf   :  { %p610_p7 = pnand %p609_p6, %p603_p3 }
  0x11   :  { %613 = shalt.err (!%p610_p7)
}
  0x12   :  { %s711_s11 = smov 64   ;;  %s712_s12 = smov 4  }
  0x13   :  { %37 = dma.hbm_to_vmem [thread:$0]  %s868_s1, 1024, %s32_s25, [#allocation7], %s711_s11, %s711_s11, %s712_s12  }
  0x14   :  { %s713_s15 = smov [#allocation3]   ;;  %s714_s17 = smov [#allocation8]  }
  0x15   :  { %s22_s16 = sshll.u32 %s713_s15, 4  ;;  %s43_s18 = sshll.u32 %s714_s17, 4  ;;  %s23_s16 = int_to_ptr.vmem [resolvable:$true] %s22_s16  ;;  %s44_s18 = int_to_ptr.vmem [resolvable:$true] %s43_s18 }
  0x16   :  { %s614_s21 = scalar_lea.hbm %s867_s0, 64 }
  0x17   :  { %p615_p8 = scmp.ne.s32.totalorder %s867_s0, %s614_s21  ;;  %p618_p9 = scmp.lt.u32.totalorder %s614_s21, %s867_s0 }
  0x19   :  { %p620_p10 = pnand %p618_p9, %p615_p8 }
  0x1b   :  { %623 = shalt.err (!%p620_p10)
}
  0x1c   :  { %s624_s1 = scalar_lea.vmem %s23_s16, 64  ;;  %p629_p12 = scmp.lt.s32.totalorder %s23_s16, %s23_s16 }
  0x1d   :  { %p625_p11 = scmp.ne.s32.totalorder %s23_s16, %s624_s1  ;;  %p630_p13 = scmp.lt.s32.totalorder %s624_s1, %s624_s1 }
  0x1f   :  { %p631_p0 = por %p630_p13, %p629_p12 }
  0x21   :  { %p632_p1 = pnand %p631_p0, %p625_p11 }
  0x23   :  { %635 = shalt.err (!%p632_p1)
}
  0x24   :  { %25 = dma.hbm_to_vmem [thread:$0]  %s867_s0, 64, %s23_s16, [#allocation4]  }
  0x25   :  { %s636_s30 = scalar_lea.hbm %s869_s2, 1024 }
  0x26   :  { %p637_p2 = scmp.ne.s32.totalorder %s869_s2, %s636_s30  ;;  %p640_p3 = scmp.lt.u32.totalorder %s636_s30, %s869_s2 }
  0x28   :  { %p642_p4 = pnand %p640_p3, %p637_p2 }
  0x2a   :  { %645 = shalt.err (!%p642_p4)
}
  0x2b   :  { %s646_s14 = scalar_lea.vmem %s44_s18, 1024  ;;  %p651_p6 = scmp.lt.s32.totalorder %s44_s18, %s44_s18 }
  0x2c   :  { %p647_p5 = scmp.ne.s32.totalorder %s44_s18, %s646_s14  ;;  %p652_p7 = scmp.lt.s32.totalorder %s646_s14, %s646_s14 }
  0x2e   :  { %p653_p8 = por %p652_p7, %p651_p6 }
  0x30   :  { %p654_p9 = pnand %p653_p8, %p647_p5 }
  0x32   :  { %657 = shalt.err (!%p654_p9)
}
  0x33   :  { %49 = dma.hbm_to_vmem [thread:$0]  %s869_s2, 1024, %s44_s18, [#allocation7], %s711_s11, %s711_s11, %s712_s12  }
  0x34   :  { %s715_s16 = smov [#allocation9]   ;;  %s658_s21 = scalar_lea.hbm %s871_s4, 1024 }
  0x35   :  { %s57_s17 = sshll.u32 %s715_s16, 4  ;;  %p659_p10 = scmp.ne.s32.totalorder %s871_s4, %s658_s21  ;;  %s58_s17 = int_to_ptr.vmem [resolvable:$true] %s57_s17 }
  0x36   :  { %p662_p11 = scmp.lt.u32.totalorder %s658_s21, %s871_s4 }
  0x38   :  { %p664_p12 = pnand %p662_p11, %p659_p10 }
  0x3a   :  { %667 = shalt.err (!%p664_p12)
}
  0x3b   :  { %s668_s1 = scalar_lea.vmem %s58_s17, 1024  ;;  %p673_p0 = scmp.lt.s32.totalorder %s58_s17, %s58_s17 }
  0x3c   :  { %p669_p13 = scmp.ne.s32.totalorder %s58_s17, %s668_s1  ;;  %p674_p1 = scmp.lt.s32.totalorder %s668_s1, %s668_s1 }
  0x3e   :  { %p675_p2 = por %p674_p1, %p673_p0 }
  0x40   :  { %p676_p3 = pnand %p675_p2, %p669_p13 }
  0x42   :  { %679 = shalt.err (!%p676_p3)
}
  0x43   :  { %63 = dma.hbm_to_vmem [thread:$0]  %s871_s4, 1024, %s58_s17, [#allocation10], %s711_s11, %s711_s11, %s712_s12  }
  0x44   :  { %702 = dma.done.wait [#allocation4], 64  }
  0x45   :  { %703 = vsyncadd [#allocation4], 4294967232 }
  0x46   :  { %704 = dma.done.wait [#allocation7], 2048  }
  0x47   :  { %705 = vsyncadd [#allocation7], 4294965248 }
  0x48   :  { %706 = dma.done.wait [#allocation10], 1024  }
  0x49   :  { %707 = vsyncadd [#allocation10], 4294966272  ;;  %v716_v0 = vmov 0.0   ;;  %vm717_vm0 = vmmov 0   ;;  %v568_v1 = vld [vmem:[#allocation6] sm:$0xff]   ;;  %v569_v2 = vld [vmem:[#allocation6 + $0x8] sm:$0xff]  }
  0x4a   :  { %499 = vmatprep.subr.bf16.mxu0 %v716_v0  ;;  %515 = vmatprep.mubr.msk.bf16.mxu0 %vm717_vm0, %v716_v0  ;;  %v570_v3 = vld [vmem:[#allocation6 + $0x10] sm:$0xff]   ;;  %v576_v4 = vld [vmem:[#allocation8] sm:$0xff]   ;;  %v571_v5 = vld [vmem:[#allocation6 + $0x18] sm:$0xff]  }
  0x4b   :  { %519 = vmatprep.subr.bf16.mxu1 %v716_v0  ;;  %535 = vmatprep.mubr.msk.bf16.mxu1 %vm717_vm0, %v716_v0  ;;  %v577_v6 = vld [vmem:[#allocation8 + $0x8] sm:$0xff]   ;;  %v572_v7 = vld [vmem:[#allocation6 + $0x20] sm:$0xff]   ;;  %v578_v8 = vld [vmem:[#allocation8 + $0x10] sm:$0xff]  }
  0x4c   :  { %500 = vmatpush3.bf16.msra.mxu0 %v568_v1  ;;  %520 = vmatpush3.bf16.msra.mxu1 %v576_v4  ;;  %v573_v9 = vld [vmem:[#allocation6 + $0x28] sm:$0xff]   ;;  %v579_v10 = vld [vmem:[#allocation8 + $0x18] sm:$0xff]   ;;  %v574_v11 = vld [vmem:[#allocation6 + $0x30] sm:$0xff]  }
  0x4d   :  { %501 = vmatprep.subr.bf16.mxu0 %v716_v0  ;;  %521 = vmatprep.subr.bf16.mxu1 %v716_v0  ;;  %v580_v12 = vld [vmem:[#allocation8 + $0x20] sm:$0xff]   ;;  %v575_v13 = vld [vmem:[#allocation6 + $0x38] sm:$0xff]   ;;  %v581_v14 = vld [vmem:[#allocation8 + $0x28] sm:$0xff]  }
  0x4e   :  { %v87_v15 = vld [vmem:[#allocation3] sm:$0xf]  ;;  %v582_v16 = vld [vmem:[#allocation8 + $0x30] sm:$0xff]   ;;  %v584_v18 = vld [vmem:[#allocation9] sm:$0xff]  }
  0x4f   :  { %v583_v17 = vld [vmem:[#allocation8 + $0x38] sm:$0xff]   ;;  %v585_v19 = vld [vmem:[#allocation9 + $0x8] sm:$0xff]   ;;  %v586_v20 = vld [vmem:[#allocation9 + $0x10] sm:$0xff]  }
  0x50   :  { %502 = vmatpush3.bf16.msra.mxu0 %v569_v2  ;;  %522 = vmatpush3.bf16.msra.mxu1 %v577_v6  ;;  %v587_v21 = vld [vmem:[#allocation9 + $0x18] sm:$0xff]   ;;  %v588_v22 = vld [vmem:[#allocation9 + $0x20] sm:$0xff]   ;;  %v589_v23 = vld [vmem:[#allocation9 + $0x28] sm:$0xff]  }
  0x51   :  { %503 = vmatprep.subr.bf16.mxu0 %v716_v0  ;;  %523 = vmatprep.subr.bf16.mxu1 %v716_v0  ;;  %v590_v29 = vld [vmem:[#allocation9 + $0x30] sm:$0xff]   ;;  %v591_v30 = vld [vmem:[#allocation9 + $0x38] sm:$0xff]  }
  0x52   :  { %v310_v31 = vld [vmem:[%s873_s6] sm:$0xf]  ;;  %s718_s6 = smov [#allocation11]  }
  0x53   :  { %v454_v32 = vld [vmem:[%s870_s3] ss:$0 sm:$0xff]  ;;  %v311_v33 = vunpack.c.l.bf16 %v310_v31  ;;  %s435_s29 = sshll.u32 %s718_s6, 4  ;;  %s436_s29 = int_to_ptr.vmem [resolvable:$true] %s435_s29 }
  0x54   :  { %504 = vmatpush3.bf16.msra.mxu0 %v570_v3  ;;  %524 = vmatpush3.bf16.msra.mxu1 %v578_v8  ;;  %v463_v43 = vld [vmem:[%s872_s5] ss:$0 sm:$0xff]  ;;  %s680_s3 = scalar_lea.vmem %s436_s29, 128  ;;  %p685_p5 = scmp.lt.s32.totalorder %s436_s29, %s436_s29 }
  0x55   :  { %505 = vmatprep.subr.bf16.mxu0 %v716_v0  ;;  %525 = vmatprep.subr.bf16.mxu1 %v716_v0  ;;  %p681_p4 = scmp.ne.s32.totalorder %s436_s29, %s680_s3  ;;  %p686_p6 = scmp.lt.s32.totalorder %s680_s3, %s680_s3 }
  0x57   :  { %p687_p7 = por %p686_p6, %p685_p5 }
  0x58   :  { %506 = vmatpush3.bf16.msra.mxu0 %v571_v5  ;;  %526 = vmatpush3.bf16.msra.mxu1 %v579_v10 }
  0x59   :  { %507 = vmatprep.subr.bf16.mxu0 %v716_v0  ;;  %527 = vmatprep.subr.bf16.mxu1 %v716_v0  ;;  %p688_p8 = pnand %p687_p7, %p681_p4 }
  0x5c   :  { %508 = vmatpush3.bf16.msra.mxu0 %v572_v7  ;;  %528 = vmatpush3.bf16.msra.mxu1 %v580_v12 }
  0x5d   :  { %509 = vmatprep.subr.bf16.mxu0 %v716_v0  ;;  %529 = vmatprep.subr.bf16.mxu1 %v716_v0 }
  0x60   :  { %510 = vmatpush3.bf16.msra.mxu0 %v573_v9  ;;  %530 = vmatpush3.bf16.msra.mxu1 %v581_v14 }
  0x61   :  { %511 = vmatprep.subr.bf16.mxu0 %v716_v0  ;;  %531 = vmatprep.subr.bf16.mxu1 %v716_v0 }
  0x64   :  { %512 = vmatpush3.bf16.msra.mxu0 %v574_v11  ;;  %532 = vmatpush3.bf16.msra.mxu1 %v582_v16 }
  0x65   :  { %513 = vmatprep.subr.bf16.mxu0 %v716_v0  ;;  %533 = vmatprep.subr.bf16.mxu1 %v716_v0 }
  0x68   :  { %514 = vmatpush3.bf16.msra.mxu0 %v575_v13  ;;  %534 = vmatpush3.bf16.msra.mxu1 %v583_v17 }
  0x69   :  { %539 = vmatprep.subr.bf16.mxu0 %v716_v0 }
  0x6b   :  { %516 = vmatmul.mubr.bf16.vlgmr.msra.gmra.mrb[0].mxu0 %v87_v15 }
  0x6c   :  { %555 = vmatprep.mubr.msk.bf16.mxu0 %vm717_vm0, %v716_v0  ;;  %540 = vmatpush3.bf16.msra.mxu0 %v584_v18 }
  0x6d   :  { %541 = vmatprep.subr.bf16.mxu0 %v716_v0 }
  0x70   :  { %542 = vmatpush3.bf16.msra.mxu0 %v585_v19 }
  0x71   :  { %543 = vmatprep.subr.bf16.mxu0 %v716_v0 }
  0x74   :  { %544 = vmatpush3.bf16.msra.mxu0 %v586_v20 }
  0x75   :  { %545 = vmatprep.subr.bf16.mxu0 %v716_v0 }
  0x78   :  { %546 = vmatpush3.bf16.msra.mxu0 %v587_v21 }
  0x79   :  { %547 = vmatprep.subr.bf16.mxu0 %v716_v0 }
  0x7c   :  { %548 = vmatpush3.bf16.msra.mxu0 %v588_v22 }
  0x7d   :  { %549 = vmatprep.subr.bf16.mxu0 %v716_v0 }
  0x80   :  { %550 = vmatpush3.bf16.msra.mxu0 %v589_v23 }
  0x81   :  { %551 = vmatprep.subr.bf16.mxu0 %v716_v0 }
  0x84   :  { %552 = vmatpush3.bf16.msra.mxu0 %v590_v29 }
  0x85   :  { %553 = vmatprep.subr.bf16.mxu0 %v716_v0 }
  0x88   :  { %554 = vmatpush3.bf16.msra.mxu0 %v591_v30 }
 0x13e   :  { %v186_v24 = vpop.f32.mrb[0].mxu0 }
 0x13f   :  { %v198_v25 = vpack.c.bf16 %v186_v24, %v186_v24  ;;  %v517_v26 = vpop.f32.mrb[1].mxu0 }
 0x140   :  { %v189_v27 = vpop.f32.mrb[2].mxu0 }
 0x141   :  { %v518_v28 = vpop.f32.mrb[3].mxu0  ;;  %536 = vmatmul.mubr.bf16.vlgmr.msra.gmra.mrb[0].mxu1 %v198_v25 }
 0x214   :  { %v304_v34 = vpop.f32.mrb[0].mxu1 }
 0x215   :  { %v305_v35 = vadd.f32 %v454_v32, %v304_v34  ;;  %v537_v36 = vpop.f32.mrb[1].mxu1 }
 0x216   :  { %v307_v37 = vpop.f32.mrb[2].mxu1 }
 0x217   :  { %v312_v38 = vmul.f32 %v311_v33, %v305_v35  ;;  %v538_v39 = vpop.f32.mrb[3].mxu1 }
 0x219   :  { %vm313_vm1 = vcmp.ge.f32.partialorder %v312_v38, 0.0  ;;  %v314_v40 = vmul.f32 0.01, %v312_v38 }
 0x21b   :  { %v315_v41 = vsel %vm313_vm1, %v312_v38, %v314_v40 }
 0x21c   :  { %v316_v42 = vpack.c.bf16 %v315_v41, %v315_v41 }
 0x21e   :  { %556 = vmatmul.mubr.bf16.vlgmr.msra.gmra.mrb[4].mxu0 %v316_v42 }
 0x2f1   :  { %v422_v44 = vpop.f32.mrb[4].mxu0 }
 0x2f2   :  { %v423_v45 = vadd.f32 %v463_v43, %v422_v44  ;;  %v557_v46 = vpop.f32.mrb[5].mxu0 }
 0x2f3   :  { %v425_v47 = vpop.f32.mrb[6].mxu0 }
 0x2f4   :  { %428 = vst [vmem:[#allocation11] sm:$0xff] %v423_v45  ;;  %v558_v48 = vpop.f32.mrb[7].mxu0 }
 0x2f5   :  { %691 = shalt.err (!%p688_p8)
}
 0x2f6   :  { %s692_s5 = scalar_lea.hbm %s874_s7, 128 }
 0x2f7   :  { %p693_p9 = scmp.ne.s32.totalorder %s874_s7, %s692_s5  ;;  %p696_p10 = scmp.lt.u32.totalorder %s692_s5, %s874_s7 }
 0x2f9   :  { %p698_p11 = pnand %p696_p10, %p693_p9 }
 0x2fb   :  { %701 = shalt.err (!%p698_p11)
}
 0x2fc   :  { %438 = dma.vmem_to_hbm [thread:$0]  %s436_s29, 128, %s874_s7, [#allocation5]  }
 0x2fd   :  { %708 = dma.done.wait [#allocation5], 128  }
 0x2fe   :  { %709 = vsyncadd [#allocation5], 4294967168 }
 0x2ff   :  { %442 = vsyncpa [#allocation4], 1 }
 0x300   :  { %443 = vsyncpa [#allocation7], 1 }
 0x301   :  { %444 = vsyncpa [#allocation10], 1 }
 0x302   :  { %445 = vsyncpa [#allocation5], 1 }

</bundles_post_ra>
